<compile_context>
chip_gen: v5e
topology: v5e:2x2
jax: 0.10.0
libtpu: 0.0.40
codegen_flags: <defaults>
</compile_context>

<pallas_src>
import functools

import jax
import jax.numpy as jnp
from jax.experimental import pallas as pl
from jax.experimental.pallas import tpu as pltpu

_LANE = 128
_VMEM_BUDGET_PER_BUFFER = 2 << 20  # ~2 MiB per input block (double-buffered by Pallas)


def _int_pow(x, p):
    """x ** p for a positive Python int p via repeated multiplies (VPU only)."""
    result = None
    base = x
    while p:
        if p & 1:
            result = base if result is None else result * base
        p >>= 1
        if p:
            base = base * base
    return result


def _channelnorm_kernel(x_ref, o_ref, *, norm_deg):
    # x_ref: (1, C, rows_tile, 128) or (1, C, t) tile of the input.
    x = x_ref[...].astype(jnp.float32)
    if norm_deg == 2:
        res = jnp.sqrt(jnp.sum(x * x, axis=1, keepdims=True))        # VPU + EUP sqrt
    elif norm_deg == 1:
        res = jnp.sum(jnp.abs(x), axis=1, keepdims=True)              # VPU only
    elif isinstance(norm_deg, int) and norm_deg > 0:
        acc = jnp.sum(_int_pow(jnp.abs(x), norm_deg), axis=1, keepdims=True)
        res = acc ** (1.0 / norm_deg)
    else:
        # Non-integer p: generic pow (2 EUP transcendentals / element).
        acc = jnp.sum(jnp.abs(x) ** norm_deg, axis=1, keepdims=True)
        res = acc ** (1.0 / norm_deg)
    o_ref[...] = res.astype(o_ref.dtype)


def _pick_tile(total, granule, budget_elems, min_blocks):
    """Largest tile that is a multiple of `granule` (or equals `total`), fits
    the VMEM budget, and yields >= min_blocks grid steps when possible."""
    max_tile = max(granule, (budget_elems // granule) * granule)
    if total <= max_tile and (min_blocks <= 1 or total <= granule):
        return total
    tile = min(max_tile, -(-total // max(min_blocks, 1)))   # ceil(total / min_blocks)
    tile = max(granule, (tile // granule) * granule)         # round down to granule
    return tile


def channel_norm(x, norm_deg=2):
    """Pallas implementation of ChannelNorm().forward(input1).

    x: (B, C, H, W) array.  Returns (B, 1, H, W) array of the same dtype.
    """
    B, C, H, W = x.shape
    HW = H * W
    itemsize = jnp.dtype(x.dtype).itemsize
    kernel = functools.partial(_channelnorm_kernel, norm_deg=norm_deg)

    # v7x shares the "parallel" grid across 2 TensorCores: keep >= 2 grid
    # steps when B == 1.
    min_blocks = 2 if B == 1 else 1

    cost = pl.CostEstimate(
        flops=2 * B * C * HW,
        transcendentals=0 if norm_deg == 1 else B * HW,
        bytes_accessed=B * C * HW * itemsize + B * HW * itemsize,
    )
    compiler_params = pltpu.CompilerParams(
        dimension_semantics=("parallel", "parallel"),
    )

    if HW % _LANE == 0:
        # Dense 4D path: (B, C, rows, 128).  Channel reduce over axis=1 is
        # pure VPU adds over (rows, 128) slabs; output stores are unmasked.
        rows = HW // _LANE
        sublane = max(8, 32 // itemsize)                      # 8 f32 / 16 bf16
        budget_rows = _VMEM_BUDGET_PER_BUFFER // (C * _LANE * itemsize)
        budget_rows = min(max(budget_rows, sublane), 512)     # cap tile at 64K lanes
        rt = _pick_tile(rows, sublane, budget_rows, min_blocks)
        grid = (B, pl.cdiv(rows, rt))
        x4 = x.reshape(B, C, rows, _LANE)
        out = pl.pallas_call(
            kernel,
            out_shape=jax.ShapeDtypeStruct((B, 1, rows, _LANE), x.dtype),
            grid_spec=pltpu.PrefetchScalarGridSpec(
                num_scalar_prefetch=0,
                grid=grid,
                in_specs=[pl.BlockSpec((1, C, rt, _LANE), lambda b, j: (b, 0, j, 0))],
                out_specs=pl.BlockSpec((1, 1, rt, _LANE), lambda b, j: (b, 0, j, 0)),
            ),
            compiler_params=compiler_params,
            cost_estimate=cost,
        )(x4)
        return out.reshape(B, 1, H, W)

    # Generic path: flatten spatial dims, tile the lane axis in multiples of
    # 128 with a possibly ragged last block.  No wrapper-side pad/slice: OOB
    # input lanes hold garbage but the reduction is per-lane over channels and
    # OOB output lanes are masked on store.
    budget_t = _VMEM_BUDGET_PER_BUFFER // (C * itemsize)
    budget_t = min(max(budget_t, _LANE), 65536)
    t = _pick_tile(HW, _LANE, budget_t, min_blocks)
    grid = (B, pl.cdiv(HW, t))
    x3 = x.reshape(B, C, HW)
    out = pl.pallas_call(
        kernel,
        out_shape=jax.ShapeDtypeStruct((B, 1, HW), x.dtype),
        grid_spec=pltpu.PrefetchScalarGridSpec(
            num_scalar_prefetch=0,
            grid=grid,
            in_specs=[pl.BlockSpec((1, C, t), lambda b, j: (b, 0, j))],
            out_specs=pl.BlockSpec((1, 1, t), lambda b, j: (b, 0, j)),
        ),
        compiler_params=compiler_params,
        cost_estimate=cost,
    )(x3)
    return out.reshape(B, 1, H, W)


def channel_norm_ref(x, norm_deg=2):
    xf = x.astype(jnp.float32)
    acc = jnp.sum(jnp.abs(xf) ** norm_deg, axis=1, keepdims=True)
    return (acc ** (1.0 / norm_deg)).astype(x.dtype)


# TODO(synk): backward pass (ChannelNormFunction.backward) not implemented; forward only.

if __name__ == "__main__":
    # Primary case (typical module input): (B, C, H, W) with H*W % 128 == 0.
    B, C, H, W = 2, 4, 16, 16
    x = jax.random.normal(jax.random.PRNGKey(0), (B, C, H, W), dtype=jnp.float32)
    y = channel_norm(x, norm_deg=2)
    jax.block_until_ready(y)
    ref = channel_norm_ref(x, norm_deg=2)
    assert y.shape == (B, 1, H, W), y.shape
    assert jnp.allclose(y, ref, rtol=1e-5, atol=1e-5), float(jnp.max(jnp.abs(y - ref)))

    # Ragged spatial size + L1 norm + B == 1 (generic path, >= 2 grid steps,
    # masked edge-block stores).
    x2 = jax.random.normal(jax.random.PRNGKey(1), (1, 3, 10, 13), dtype=jnp.float32)
    y2 = channel_norm(x2, norm_deg=1)
    jax.block_until_ready(y2)
    ref2 = channel_norm_ref(x2, norm_deg=1)
    assert y2.shape == (1, 1, 10, 13), y2.shape
    assert jnp.allclose(y2, ref2, rtol=1e-5, atol=1e-5), float(jnp.max(jnp.abs(y2 - ref2)))

    # Odd integer norm degree (integer-power fast path).
    y3 = channel_norm(x, norm_deg=3)
    jax.block_until_ready(y3)
    ref3 = channel_norm_ref(x, norm_deg=3)
    assert jnp.allclose(y3, ref3, rtol=1e-4, atol=1e-5), float(jnp.max(jnp.abs(y3 - ref3)))

    print("KERNEL_OK")
</pallas_src>

<mosaic_0001>
module attributes {stable_mosaic.version = 11 : i64} {
  func.func @_channelnorm_kernel(%arg0: i32, %arg1: i32, %arg2: memref<1x4x2x128xf32, #tpu.memory_space<vmem>>, %arg3: memref<1x1x2x128xf32, #tpu.memory_space<vmem>>) attributes {dimension_semantics = [#tpu.dimension_semantics<parallel>, #tpu.dimension_semantics<parallel>], iteration_bounds = array<i64: 2, 1>, scalar_prefetch = 0 : i64, scratch_operands = 0 : i64, tpu.core_type = #tpu.core_type<tc>, window_params = [{transform_indices = @transform_0, window_bounds = array<i64: 1, 4, 2, 128>}, {transform_indices = @transform_1, window_bounds = array<i64: 1, 1, 2, 128>}]} {
    %c0 = arith.constant 0 : index
    %c0_0 = arith.constant 0 : index
    %c0_1 = arith.constant 0 : index
    %c0_2 = arith.constant 0 : index
    %0 = vector.load %arg2[%c0, %c0_0, %c0_1, %c0_2] : memref<1x4x2x128xf32, #tpu.memory_space<vmem>>, vector<1x4x2x128xf32>
    %1 = arith.mulf %0, %0 : vector<1x4x2x128xf32>
    %cst = arith.constant dense<0.000000e+00> : vector<1x2x128xf32>
    %2 = vector.multi_reduction <add>, %1, %cst [1] : vector<1x4x2x128xf32> to vector<1x2x128xf32>
    %3 = vector.shape_cast %2 : vector<1x2x128xf32> to vector<1x1x2x128xf32>
    %4 = math.sqrt %3 : vector<1x1x2x128xf32>
    %c0_3 = arith.constant 0 : index
    %c0_4 = arith.constant 0 : index
    %c0_5 = arith.constant 0 : index
    %c0_6 = arith.constant 0 : index
    %5 = vector.load %arg3[%c0_3, %c0_4, %c0_5, %c0_6] : memref<1x1x2x128xf32, #tpu.memory_space<vmem>>, vector<1x1x2x128xf32>
    tpu.vector_store %arg3[%c0_3, %c0_4, %c0_5, %c0_6], %4 {strides = array<i32>} : memref<1x1x2x128xf32, #tpu.memory_space<vmem>>, vector<1x1x2x128xf32>,
    return
  }
  func.func @transform_0(%arg0: i32, %arg1: i32) -> (i32, i32, i32, i32) {
    %c0_i32 = arith.constant 0 : i32
    %c0_i32_0 = arith.constant 0 : i32
    %c0_i32_1 = arith.constant 0 : i32
    return %arg0, %c0_i32, %arg1, %c0_i32_0 : i32, i32, i32, i32
  }
  func.func @transform_1(%arg0: i32, %arg1: i32) -> (i32, i32, i32, i32) {
    %c0_i32 = arith.constant 0 : i32
    %c0_i32_0 = arith.constant 0 : i32
    %c0_i32_1 = arith.constant 0 : i32
    return %arg0, %c0_i32, %arg1, %c0_i32_0 : i32, i32, i32, i32
  }
}

</mosaic_0001>

<bundles_post_ra>
// kernel: tpu_custom_call.1
= control target key start
LH: loop header
LB: loop body
LE: loop exit
PB: predicated region body
PF: predicated region fallthrough
CT: control target
= control target key end

     0   :  { %6 = vsyncpa [#allocation3], 0  ;;  %s609_s0 = inlined_call_operand.hbm [shape: f32[2,4,2,128], index: 0, kind: input, shape index: {}]   ;;  %s610_s1 = inlined_call_operand.hbm [shape: f32[2,1,2,128], index: 1, kind: output, shape index: {}]  }
   0x1   :  { %8 = vsyncpa [#allocation3 + $0x1], 0 }
   0x2   :  { %9 = vsyncpa [#allocation4], 0 }
   0x3   :  { %11 = vsyncpa [#allocation4 + $0x1], 0  ;;  %s488_s6 = smov 0   ;;  %s490_s7 = smov 0  }
   0x4   :  { %s492_s8 = smov 0   ;;  %s494_s9 = smov 0  }
   0x5   :  { %s496_s10 = smov 0   ;;  %s498_s11 = smov 0  }
   0x6 LB: > { %s281_s12 = sadd.s32 4294967295, %s474_s11   ;;  %s282_s13 = sadd.s32 4294967294, %s474_s11   ;;  %s474_s11 = sphi %s498_s11, %s17_s11   ;;  %s470_s10 = sphi %s496_s10, %s619_s10   ;;  %s466_s9 = sphi %s494_s9, %s618_s9   ;;  %s462_s8 = sphi %s492_s8, %s617_s8   ;;  %s458_s7 = sphi %s490_s7, %s616_s7   ;;  %s454_s6 = sphi %s488_s6, %s615_s6  }
   0x7   : > { %s29_s14 = sadd.s32 1, %s470_s10  ;;  %s38_s15 = sadd.s32 1, %s462_s8 }
   0x8   : > { %p31_p0 = scmp.ge.s32.totalorder %s29_s14, 2  ;;  %p45_p1 = scmp.ne.s32.totalorder %s462_s8, %s458_s7 }
   0x9   : > { %p46_p2 = scmp.eq.s32.totalorder %s474_s11, 0  ;;  %p51_p3 = scmp.ne.s32.totalorder %s458_s7, %s454_s6 }
   0xa   : > { %s621_s14 = smov (%p31_p0, %s29_s14), 0  ;;  %p52_p5 = scmp.eq.s32.totalorder %s281_s12, 0 }
   0xb   : > { %p529_p4 = por %p46_p2, %p45_p1  ;;  %s33_s17 = ssub.s32 %s470_s10, %s621_s14 }
   0xc   : > { %p77_p6 = scmp.eq.s32.totalorder %s281_s12, 1  ;;  %p36_p7 = scmp.eq.s32.totalorder %s33_s17, 0 }
   0xd   : > { %p535_p8 = por %p52_p5, %p51_p3  ;;  %p83_p10 = scmp.eq.s32.totalorder %s282_s13, 1 }
   0xe   : > { %p539_p9 = por %p77_p6, %p45_p1  ;;  %p284_p12 = scmp.ge.s32.totalorder %s474_s11, 2 }
   0xf   : > { %s544_s20 = scalar_select %p36_p7, %s462_s8, %s38_s15  }
  0x10   : > { %p546_p11 = por %p83_p10, %p51_p3  ;;  %p308_p13 = scmp.lt.s32.totalorder %s474_s11, 2 }
  0x11   : > { %s103_s22 = sand.u32 1, %s462_s8   ;;  %s295_s24 = sshll.u32 %s470_s10, 3 }
  0x12   : > { %s285_s23 = sshll.u32 %s103_s22, 3  ;;  %s113_s27 = scalar_lea.hbm %s609_s0, %s295_s24 }
  0x13   : > { %s107_s28 = scalar_lea.vmem [#allocation2], %s285_s23  ;;  %s114_s30 = sshll.u32 %s113_s27, 4  ;;  %s115_s30 = int_to_ptr.hbm [resolvable:$true] %s114_s30 }
  0x14   : > { %s116_s29 = sshll.u32 %s107_s28, 4  ;;  %p301_p0 = pnand %p308_p13, %p529_p4  ;;  %s117_s29 = int_to_ptr.vmem [resolvable:$true] %s116_s29 }
  0x15   : > { %p288_p1 = scmp.ge.s32.totalorder %s474_s11, 1  ;;  %s104_s2 = scalar_lea.sflag [#allocation3], %s103_s22 }
  0x16   : > { %s476_s3 = smov 32   ;;  %s477_s4 = smov 2  }
  0x17   : > { %303 = dma.hbm_to_vmem [thread:$0]  (!%p301_p0), %s115_s30, 128, %s117_s29, %s104_s2, %s476_s3, %s476_s3, %s477_s4  }
  0x18   : > { %p124_p2 = scmp.lt.s32.totalorder %s474_s11, 3 }
  0x1a   : > { %p125_p3 = pnand %p288_p1, %p124_p2 }
  0x1b   : > { %s562_s5 = sand.u32 (!%p125_p3), 1, %s458_s7  }
  0x1c   : > { %128 = sbr.rel (%p125_p3) target bundleno = 68 (0x44), region = 24  ;;  %s289_s12 = sshll.u32 (!%p125_p3), %s562_s5, 3 }
  0x1d   : > { %s131_s13 = scalar_lea.sflag (!%p125_p3), [#allocation3], %s562_s5  ;;  %s134_s15 = scalar_lea.vmem (!%p125_p3), [#allocation2], %s289_s12 }
  0x21   : > { %445 = dma.done.wait (%p535_p8), %s131_s13, 128  }
  0x22   : > { %447 = vsyncadd (%p535_p8), %s131_s13, 4294967168  ;;  %vm162_vm0 = vcmask 1041408   ;;  %v154_v0 = vld [vmem:[%s134_s15] sm:$0x3]  ;;  %v155_v1 = vld [vmem:[%s134_s15 + $0x2] sm:$0x3] }
  0x23   : > { %v156_v2 = vld [vmem:[%s134_s15 + $0x4] sm:$0x3]  ;;  %v157_v3 = vld [vmem:[%s134_s15 + $0x6] sm:$0x3]  ;;  %v158_v4 = vmul.f32 %v154_v0, %v154_v0  ;;  %v159_v5 = vmul.f32 %v155_v1, %v155_v1  ;;  %s290_s16 = sshll.u32 %s562_s5, 1  ;;  %s292_s17 = sshll.u32 %s466_s9, 1 }
  0x24   : > { %v160_v6 = vmul.f32 %v156_v2, %v156_v2  ;;  %v161_v7 = vmul.f32 %v157_v3, %v157_v3  ;;  %s195_s23 = scalar_lea.hbm %s610_s1, %s292_s17  ;;  %s153_s24 = scalar_lea.vmem [#allocation5], %s290_s16 }
  0x25   : > { %v163_v8 = vsel %vm162_vm0, %v158_v4, 0.0  ;;  %v164_v9 = vsel %vm162_vm0, %v159_v5, 0.0  ;;  %s197_s25 = sshll.u32 %s153_s24, 4  ;;  %s199_s26 = sshll.u32 %s195_s23, 4  ;;  %s198_s25 = int_to_ptr.vmem [resolvable:$true] %s197_s25  ;;  %s200_s26 = int_to_ptr.hbm [resolvable:$true] %s199_s26 }
  0x26   : > { %v166_v10 = vsel %vm162_vm0, %v160_v6, 0.0  ;;  %v165_v11 = vadd.f32 %v164_v9, %v163_v8  ;;  %v168_v12 = vsel %vm162_vm0, %v161_v7, 0.0  ;;  %s184_s9 = scalar_lea.sflag [#allocation4], %s562_s5  ;;  %s406_s27 = sshra.s32 %s200_s26, 4  ;;  %s407_s27 = int_to_ptr.hbm [resolvable:$true] %s406_s27 }
  0x27   : > { %s408_s28 = scalar_lea.hbm %s407_s27, 2  ;;  %s412_s2 = scalar_lea.hbm %s610_s1, 4 }
  0x28   : > { %v167_v13 = vadd.f32 %v166_v10, %v165_v11  ;;  %p409_p4 = scmp.ne.s32.totalorder %s407_s27, %s408_s28  ;;  %p413_p7 = scmp.lt.s32.totalorder %s407_s27, %s610_s1 }
  0x29   : > { %p414_p8 = scmp.lt.s32.totalorder %s412_s2, %s408_s28 }
  0x2a   : > { %v169_v14 = vadd.f32 %v168_v12, %v167_v13  ;;  %p410_p5 = pnand %p409_p4, %p539_p9 }
  0x2b   : > { %p415_p10 = por %p414_p8, %p413_p7 }
  0x2c   : > { %360 = vrsqrt.f32 %v169_v14  ;;  %vm177_vm1 = vcmp.eq.f32.partialorder %v169_v14, inf  ;;  %v180_v21 = vand.u32 2147483648, %v169_v14  ;;  %vm179_vm2 = vcmp.eq.f32.partialorder %v169_v14, 0.0  ;;  %p411_p6 = pneg %p410_p5 }
  0x2e   : > { %p416_p13 = pnand %p415_p10, %p411_p6 }
  0x32   : > { %v361_v15 = vpop.eup %360 }
  0x33   : > { %v171_v16 = vmul.f32 %v361_v15, %v169_v14 }
  0x35   : > { %v172_v17 = vmul.f32 %v361_v15, %v171_v16 }
  0x37   : > { %v173_v18 = vmul.f32 0.5, %v172_v17 }
  0x39   : > { %v174_v19 = vsub.f32 1.5, %v173_v18 }
  0x3b   : > { %v175_v20 = vmul.f32 %v361_v15, %v174_v19 }
  0x3d   : > { %v176_v22 = vmul.f32 %v175_v20, %v169_v14 }
  0x3f   : > { %v178_v23 = vsel %vm177_vm1, %v169_v14, %v176_v22 }
  0x40   : > { %v181_v24 = vsel %vm179_vm2, %v180_v21, %v178_v23 }
  0x41   : > { %182 = vst [vmem:[%s153_s24] sm:$0x3] %v181_v24 }
  0x42   : > { %419 = shalt.err (!%p416_p13)
}
  0x43   : > { %298 = dma.vmem_to_hbm [thread:$0]  (%p539_p9), %s198_s25, 32, %s200_s26, %s184_s9  }
  0x44 PF: > { %s211_s5 = sand.u32 1, %s454_s6   ;;  %p305_p0 = pnand %p284_p12, %p546_p11 }
  0x45   : > { %s212_s12 = scalar_lea.sflag [#allocation4], %s211_s5 }
  0x46   : > { %p306_p1 = pneg %p305_p0 }
  0x48   : > { %449 = dma.done.wait (%p306_p1), %s212_s12, 32  }
  0x49   : > { %451 = vsyncadd (%p306_p1), %s212_s12, 4294967264  ;;  %s17_s11 = sadd.s32 1, %s474_s11   ;;  %s615_s6 = smov %s458_s7 }
  0x4a   : > { %p14_p2 = scmp.ge.s32.totalorder %s17_s11, 4   ;;  %s616_s7 = smov %s462_s8 }
  0x4b   : > { %s617_s8 = smov %s544_s20  ;;  %s618_s9 = smov %s470_s10 }
  0x4c   : > { %s619_s10 = smov %s621_s14  ;;  %16 = sbr.rel (!%p14_p2) target bundleno = 6 (0x6), region = 69 }
  0x51   :  { %218 = vsyncpa [#allocation3], 1 }
  0x52   :  { %220 = vsyncpa [#allocation3 + $0x1], 1 }
  0x53   :  { %221 = vsyncpa [#allocation4], 1 }
  0x54   :  { %223 = vsyncpa [#allocation4 + $0x1], 1 }

</bundles_post_ra>
